<compile_context>
chip_gen: v6e
topology: v6e:2x2x1
jax: 0.10.0
libtpu: 0.0.40
codegen_flags: <defaults>
</compile_context>

<pallas_src>
import functools
import math

import jax
import jax.numpy as jnp
from jax import lax
from jax.experimental import pallas as pl
from jax.experimental.pallas import tpu as pltpu

EPS = 1e-6
LANE = 128          # vreg lanes (fast axis)
SUB = 8             # vreg sublanes for f32 (slow axis)
BLOCK_S = 512       # sublane rows per grid step: 9*512*128*4B = 2.25 MiB/input


def _cdiv(a, b):
    return (a + b - 1) // b


def _round_up(a, b):
    return _cdiv(a, b) * b


def _acos_f32(x):
    """arccos(x) for x in (-1, 1) via the Cephes asinf minimax polynomial.

    Uses only abs / sqrt / select / mul / add (all guaranteed Mosaic
    lowerings); absolute error < ~1e-6 rad.
    """
    a = jnp.abs(x)
    small = a <= 0.5
    z = jnp.where(small, a * a, 0.5 * (1.0 - a))
    s = jnp.where(small, a, jnp.sqrt(z))
    # asin(s) = s + s*z*P(z) for s in [0, 0.5], z = s^2   (Cephes asinf)
    p = 4.2163199048e-2
    p = p * z + 2.4181311049e-2
    p = p * z + 4.5470025998e-2
    p = p * z + 7.4953002686e-2
    p = p * z + 1.6666752422e-1
    asin_s = s + s * z * p
    acos_a = jnp.where(small, (0.5 * math.pi) - asin_s, 2.0 * asin_s)
    return jnp.where(x < 0.0, math.pi - acos_a, acos_a)


def _chunk_loss(label_ref, pred_ref, row0, *, eps, include_small_branch):
    """Per-sample loss for one (SUB, LANE) chunk of the SoA layout."""
    L = [label_ref[j, pl.ds(row0, SUB), :] for j in range(9)]
    P = [pred_ref[j, pl.ds(row0, SUB), :] for j in range(9)]

    def d(a, b):
        # (R_label^T @ R_pred)[a, b] = sum_k R_label[k, a] * R_pred[k, b];
        # entry (k, j) of the row-major 3x3 lives on plane 3*k + j.
        return L[a] * P[b] + L[3 + a] * P[3 + b] + L[6 + a] * P[6 + b]

    trace = d(0, 0) + d(1, 1) + d(2, 2)
    cos_t = jnp.clip((trace - 1.0) * 0.5, -1.0 + eps, 1.0 - eps)
    theta = _acos_f32(cos_t)
    # sin(arccos(x)) == sqrt(1 - x^2): no second transcendental.
    sin_t = jnp.sqrt(jnp.maximum(1.0 - cos_t * cos_t, 0.0))
    scale = theta / (2.0 * sin_t + eps)          # one divide per sample
    if include_small_branch:
        # Only reachable when arccos(1 - eps) < eps (i.e. a very large eps).
        scale = jnp.where(theta < eps, 0.5, scale)

    d0 = d(2, 1) - d(1, 2)
    d1 = d(0, 2) - d(2, 0)
    d2 = d(1, 0) - d(0, 1)
    w0 = scale * d0
    w1 = scale * d1
    w2 = scale * d2
    return jnp.sqrt(w0 * w0 + w1 * w1 + w2 * w2)   # (SUB, LANE)


def _lie_sum_kernel(label_ref, pred_ref, out_ref, *, eps,
                    include_small_branch, n_chunks):
    """Accumulates an (8,128) partial-sum vreg per partition in out_ref."""
    i = pl.program_id(1)                           # reduction (tile) axis

    @pl.when(i == 0)
    def _init():
        out_ref[...] = jnp.zeros_like(out_ref)

    def body(c, acc):
        row0 = pl.multiple_of(c * SUB, SUB)
        return acc + _chunk_loss(label_ref, pred_ref, row0, eps=eps,
                                 include_small_branch=include_small_branch)

    out_ref[0] += lax.fori_loop(0, n_chunks, body,
                                jnp.zeros((SUB, LANE), jnp.float32))


def _lie_none_kernel(label_ref, pred_ref, out_ref, *, eps,
                     include_small_branch, n_chunks):
    """Writes the lane-dense per-sample loss tile."""
    def body(c, carry):
        row0 = pl.multiple_of(c * SUB, SUB)
        out_ref[pl.ds(row0, SUB), :] = _chunk_loss(
            label_ref, pred_ref, row0, eps=eps,
            include_small_branch=include_small_branch)
        return carry

    lax.fori_loop(0, n_chunks, body, 0)


def lie_algebra_loss(R_pred, R_label, reduction: str = "mean",
                     eps: float = EPS):
    """R_pred, R_label: (B, 3, 3) rotations. Returns scalar (mean/sum) or (B,)."""
    assert R_pred.shape == R_label.shape and R_pred.shape[-2:] == (3, 3)
    if reduction not in ("mean", "sum", "none"):
        raise ValueError(f"unknown reduction: {reduction}")
    B = R_pred.shape[0]

    # ---- tiling -----------------------------------------------------------
    s_needed = _round_up(max(_cdiv(B, LANE), 1), SUB)   # sublane rows of batch
    if s_needed <= BLOCK_S:
        num_parallel, tiles_per_part, tile_s = 1, 1, s_needed
    else:
        num_parallel = 2                                 # v7x: 2 TensorCores
        per_part = _round_up(_cdiv(s_needed, num_parallel), SUB)
        tile_s = min(BLOCK_S, per_part)
        tiles_per_part = _cdiv(per_part, tile_s)
    s_pad = num_parallel * tiles_per_part * tile_s
    b_pad = s_pad * LANE
    n_chunks = tile_s // SUB

    # ---- layout glue: pad with identity rotations (exactly zero loss) and
    # rearrange into the SoA (9, s_pad, 128) layout (sample b -> [:, b//128, b%128]).
    # TODO(synk): this transpose is a separate XLA op with an extra HBM
    # round-trip; storing rotations SoA upstream would remove it.
    pred_flat = R_pred.reshape(B, 9).astype(jnp.float32)
    label_flat = R_label.reshape(B, 9).astype(jnp.float32)
    if b_pad != B:
        eye = jnp.broadcast_to(
            jnp.eye(3, dtype=jnp.float32).reshape(1, 9), (b_pad - B, 9))
        pred_flat = jnp.concatenate([pred_flat, eye], axis=0)
        label_flat = jnp.concatenate([label_flat, eye], axis=0)
    pred_9 = pred_flat.T.reshape(9, s_pad, LANE)
    label_9 = label_flat.T.reshape(9, s_pad, LANE)

    # Small-angle branch is dead whenever arccos(1 - eps) >= eps.
    theta_min = math.acos(max(-1.0, min(1.0, 1.0 - eps)))
    include_small_branch = theta_min < eps

    in_spec = pl.BlockSpec(
        (9, tile_s, LANE),
        lambda p, i: (0, p * tiles_per_part + i, 0))
    vmem_limit = 32 * 1024 * 1024

    if reduction == "none":
        kernel = functools.partial(
            _lie_none_kernel, eps=float(eps),
            include_small_branch=include_small_branch, n_chunks=n_chunks)
        out = pl.pallas_call(
            kernel,
            out_shape=jax.ShapeDtypeStruct((s_pad, LANE), jnp.float32),
            grid_spec=pltpu.PrefetchScalarGridSpec(
                num_scalar_prefetch=0,
                grid=(num_parallel, tiles_per_part),
                in_specs=[in_spec, in_spec],
                out_specs=pl.BlockSpec(
                    (tile_s, LANE),
                    lambda p, i: (p * tiles_per_part + i, 0))),
            compiler_params=pltpu.CompilerParams(
                dimension_semantics=("parallel", "parallel"),
                vmem_limit_bytes=vmem_limit),
        )(label_9, pred_9)
        return out.reshape(b_pad)[:B]

    kernel = functools.partial(
        _lie_sum_kernel, eps=float(eps),
        include_small_branch=include_small_branch, n_chunks=n_chunks)
    partial_sums = pl.pallas_call(
        kernel,
        out_shape=jax.ShapeDtypeStruct((num_parallel, SUB, LANE), jnp.float32),
        grid_spec=pltpu.PrefetchScalarGridSpec(
            num_scalar_prefetch=0,
            grid=(num_parallel, tiles_per_part),
            in_specs=[in_spec, in_spec],
            out_specs=pl.BlockSpec((1, SUB, LANE), lambda p, i: (p, 0, 0))),
        compiler_params=pltpu.CompilerParams(
            dimension_semantics=("parallel", "arbitrary"),
            vmem_limit_bytes=vmem_limit),
    )(label_9, pred_9)

    total = jnp.sum(partial_sums)
    if reduction == "mean":
        return total / jnp.float32(B)
    return total


# ---------------------------------------------------------------------------
# Pure-JAX reference (mirrors the PyTorch module) for a sanity check.
# ---------------------------------------------------------------------------
def _reference_loss(R_pred, R_label, reduction="mean", eps=EPS):
    R_diff = jnp.swapaxes(R_label, -2, -1) @ R_pred
    trace = jnp.trace(R_diff, axis1=-2, axis2=-1)
    theta = jnp.arccos(jnp.clip((trace - 1.0) / 2.0, -1.0 + eps, 1.0 - eps))
    small = theta < eps
    denom = 2.0 * jnp.sin(theta)[:, None, None] + eps
    omega_hat = (R_diff - jnp.swapaxes(R_diff, -2, -1)) / denom
    omega = jnp.stack(
        [omega_hat[..., 2, 1], omega_hat[..., 0, 2], omega_hat[..., 1, 0]],
        axis=-1)
    omega_small = 0.5 * jnp.stack(
        [R_diff[:, 2, 1] - R_diff[:, 1, 2],
         R_diff[:, 0, 2] - R_diff[:, 2, 0],
         R_diff[:, 1, 0] - R_diff[:, 0, 1]], axis=-1)
    omega = jnp.where(small[:, None], omega_small, theta[:, None] * omega)
    per_sample = jnp.linalg.norm(omega, axis=-1)
    if reduction == "none":
        return per_sample
    return jnp.mean(per_sample) if reduction == "mean" else jnp.sum(per_sample)


def _random_rotations(key, batch):
    """Deterministic SO(3) matrices via Rodrigues' formula (test glue)."""
    k1, k2 = jax.random.split(key)
    axis = jax.random.normal(k1, (batch, 3), dtype=jnp.float32)
    axis = axis / (jnp.linalg.norm(axis, axis=-1, keepdims=True) + 1e-12)
    angle = jax.random.uniform(k2, (batch,), minval=0.1, maxval=1.4,
                               dtype=jnp.float32)
    x, y, z = axis[:, 0], axis[:, 1], axis[:, 2]
    zeros = jnp.zeros_like(x)
    K = jnp.stack([zeros, -z, y,
                   z, zeros, -x,
                   -y, x, zeros], axis=-1).reshape(batch, 3, 3)
    I = jnp.eye(3, dtype=jnp.float32)[None]
    s = jnp.sin(angle)[:, None, None]
    c = jnp.cos(angle)[:, None, None]
    return I + s * K + (1.0 - c) * (K @ K)


if __name__ == "__main__":
    # Case 1: small batch, mean reduction.
    kp, kl = jax.random.split(jax.random.PRNGKey(0))
    B = 8
    R_pred = _random_rotations(kp, B)
    R_label = _random_rotations(kl, B)

    loss = jax.block_until_ready(
        lie_algebra_loss(R_pred, R_label, reduction="mean"))
    ref = _reference_loss(R_pred, R_label, reduction="mean")
    assert jnp.allclose(loss, ref, atol=1e-4, rtol=1e-4), (loss, ref)

    # Case 2: batch not a multiple of 128 (exercises identity padding), sum.
    kp2, kl2 = jax.random.split(jax.random.PRNGKey(1))
    B2 = 200
    R_pred2 = _random_rotations(kp2, B2)
    R_label2 = _random_rotations(kl2, B2)

    loss2 = jax.block_until_ready(
        lie_algebra_loss(R_pred2, R_label2, reduction="sum"))
    ref2 = _reference_loss(R_pred2, R_label2, reduction="sum")
    assert jnp.allclose(loss2, ref2, atol=1e-3, rtol=1e-4), (loss2, ref2)

    # Case 3: per-sample losses (reduction='none').
    loss3 = jax.block_until_ready(
        lie_algebra_loss(R_pred2, R_label2, reduction="none"))
    ref3 = _reference_loss(R_pred2, R_label2, reduction="none")
    assert loss3.shape == (B2,)
    assert jnp.allclose(loss3, ref3, atol=1e-4, rtol=1e-4), (loss3, ref3)

    print("KERNEL_OK")
</pallas_src>

<mosaic_0001>
module attributes {stable_mosaic.version = 11 : i64} {
  func.func @_lie_sum_kernel(%arg0: i32, %arg1: i32, %arg2: memref<9x8x128xf32, #tpu.memory_space<vmem>>, %arg3: memref<9x8x128xf32, #tpu.memory_space<vmem>>, %arg4: memref<1x8x128xf32, #tpu.memory_space<vmem>>) attributes {dimension_semantics = [#tpu.dimension_semantics<parallel>, #tpu.dimension_semantics<arbitrary>], iteration_bounds = array<i64: 1, 1>, scalar_prefetch = 0 : i64, scratch_operands = 0 : i64, tpu.core_type = #tpu.core_type<tc>, window_params = [{transform_indices = @transform_0, window_bounds = array<i64: 9, 8, 128>}, {transform_indices = @transform_1, window_bounds = array<i64: 9, 8, 128>}, {transform_indices = @transform_2, window_bounds = array<i64: 1, 8, 128>}]} {
    %c0_i32 = arith.constant 0 : i32
    %0 = arith.cmpi eq, %arg1, %c0_i32 : i32
    %1 = arith.extui %0 : i1 to i32
    %c0_i32_0 = arith.constant 0 : i32
    %2 = arith.cmpi ne, %1, %c0_i32_0 : i32
    scf.if %2 {
      %cst_55 = arith.constant 0.000000e+00 : f32
      %182 = vector.broadcast %cst_55 : f32 to vector<1x8x128xf32>
      %c0_56 = arith.constant 0 : index
      %c0_57 = arith.constant 0 : index
      %c0_58 = arith.constant 0 : index
      %183 = vector.load %arg4[%c0_56, %c0_57, %c0_58] : memref<1x8x128xf32, #tpu.memory_space<vmem>>, vector<1x8x128xf32>
      tpu.vector_store %arg4[%c0_56, %c0_57, %c0_58], %182 {strides = array<i32>} : memref<1x8x128xf32, #tpu.memory_space<vmem>>, vector<1x8x128xf32>,
    } else {
    }
    %c0 = arith.constant 0 : index
    %c0_1 = arith.constant 0 : index
    %c0_2 = arith.constant 0 : index
    %3 = vector.load %arg4[%c0, %c0_1, %c0_2] : memref<1x8x128xf32, #tpu.memory_space<vmem>>, vector<1x8x128xf32>
    %4 = vector.shape_cast %3 : vector<1x8x128xf32> to vector<8x128xf32>
    %cst = arith.constant 0.000000e+00 : f32
    %5 = vector.broadcast %cst : f32 to vector<8x128xf32>
    %c0_i32_3 = arith.constant 0 : i32
    %c8_i32 = arith.constant 8 : i32
    %6 = arith.muli %c0_i32_3, %c8_i32 : i32
    %7 = tpu.assume_multiple %6, 8 : i32
    %c0_4 = arith.constant 0 : index
    %8 = arith.index_cast %7 : i32 to index
    %c0_5 = arith.constant 0 : index
    %9 = vector.load %arg2[%c0_4, %8, %c0_5] : memref<9x8x128xf32, #tpu.memory_space<vmem>>, vector<1x8x128xf32>
    %10 = vector.shape_cast %9 : vector<1x8x128xf32> to vector<8x128xf32>
    %c1 = arith.constant 1 : index
    %11 = arith.index_cast %7 : i32 to index
    %c0_6 = arith.constant 0 : index
    %12 = vector.load %arg2[%c1, %11, %c0_6] : memref<9x8x128xf32, #tpu.memory_space<vmem>>, vector<1x8x128xf32>
    %13 = vector.shape_cast %12 : vector<1x8x128xf32> to vector<8x128xf32>
    %c2 = arith.constant 2 : index
    %14 = arith.index_cast %7 : i32 to index
    %c0_7 = arith.constant 0 : index
    %15 = vector.load %arg2[%c2, %14, %c0_7] : memref<9x8x128xf32, #tpu.memory_space<vmem>>, vector<1x8x128xf32>
    %16 = vector.shape_cast %15 : vector<1x8x128xf32> to vector<8x128xf32>
    %c3 = arith.constant 3 : index
    %17 = arith.index_cast %7 : i32 to index
    %c0_8 = arith.constant 0 : index
    %18 = vector.load %arg2[%c3, %17, %c0_8] : memref<9x8x128xf32, #tpu.memory_space<vmem>>, vector<1x8x128xf32>
    %19 = vector.shape_cast %18 : vector<1x8x128xf32> to vector<8x128xf32>
    %c4 = arith.constant 4 : index
    %20 = arith.index_cast %7 : i32 to index
    %c0_9 = arith.constant 0 : index
    %21 = vector.load %arg2[%c4, %20, %c0_9] : memref<9x8x128xf32, #tpu.memory_space<vmem>>, vector<1x8x128xf32>
    %22 = vector.shape_cast %21 : vector<1x8x128xf32> to vector<8x128xf32>
    %c5 = arith.constant 5 : index
    %23 = arith.index_cast %7 : i32 to index
    %c0_10 = arith.constant 0 : index
    %24 = vector.load %arg2[%c5, %23, %c0_10] : memref<9x8x128xf32, #tpu.memory_space<vmem>>, vector<1x8x128xf32>
    %25 = vector.shape_cast %24 : vector<1x8x128xf32> to vector<8x128xf32>
    %c6 = arith.constant 6 : index
    %26 = arith.index_cast %7 : i32 to index
    %c0_11 = arith.constant 0 : index
    %27 = vector.load %arg2[%c6, %26, %c0_11] : memref<9x8x128xf32, #tpu.memory_space<vmem>>, vector<1x8x128xf32>
    %28 = vector.shape_cast %27 : vector<1x8x128xf32> to vector<8x128xf32>
    %c7 = arith.constant 7 : index
    %29 = arith.index_cast %7 : i32 to index
    %c0_12 = arith.constant 0 : index
    %30 = vector.load %arg2[%c7, %29, %c0_12] : memref<9x8x128xf32, #tpu.memory_space<vmem>>, vector<1x8x128xf32>
    %31 = vector.shape_cast %30 : vector<1x8x128xf32> to vector<8x128xf32>
    %c8 = arith.constant 8 : index
    %32 = arith.index_cast %7 : i32 to index
    %c0_13 = arith.constant 0 : index
    %33 = vector.load %arg2[%c8, %32, %c0_13] : memref<9x8x128xf32, #tpu.memory_space<vmem>>, vector<1x8x128xf32>
    %34 = vector.shape_cast %33 : vector<1x8x128xf32> to vector<8x128xf32>
    %c0_14 = arith.constant 0 : index
    %35 = arith.index_cast %7 : i32 to index
    %c0_15 = arith.constant 0 : index
    %36 = vector.load %arg3[%c0_14, %35, %c0_15] : memref<9x8x128xf32, #tpu.memory_space<vmem>>, vector<1x8x128xf32>
    %37 = vector.shape_cast %36 : vector<1x8x128xf32> to vector<8x128xf32>
    %c1_16 = arith.constant 1 : index
    %38 = arith.index_cast %7 : i32 to index
    %c0_17 = arith.constant 0 : index
    %39 = vector.load %arg3[%c1_16, %38, %c0_17] : memref<9x8x128xf32, #tpu.memory_space<vmem>>, vector<1x8x128xf32>
    %40 = vector.shape_cast %39 : vector<1x8x128xf32> to vector<8x128xf32>
    %c2_18 = arith.constant 2 : index
    %41 = arith.index_cast %7 : i32 to index
    %c0_19 = arith.constant 0 : index
    %42 = vector.load %arg3[%c2_18, %41, %c0_19] : memref<9x8x128xf32, #tpu.memory_space<vmem>>, vector<1x8x128xf32>
    %43 = vector.shape_cast %42 : vector<1x8x128xf32> to vector<8x128xf32>
    %c3_20 = arith.constant 3 : index
    %44 = arith.index_cast %7 : i32 to index
    %c0_21 = arith.constant 0 : index
    %45 = vector.load %arg3[%c3_20, %44, %c0_21] : memref<9x8x128xf32, #tpu.memory_space<vmem>>, vector<1x8x128xf32>
    %46 = vector.shape_cast %45 : vector<1x8x128xf32> to vector<8x128xf32>
    %c4_22 = arith.constant 4 : index
    %47 = arith.index_cast %7 : i32 to index
    %c0_23 = arith.constant 0 : index
    %48 = vector.load %arg3[%c4_22, %47, %c0_23] : memref<9x8x128xf32, #tpu.memory_space<vmem>>, vector<1x8x128xf32>
    %49 = vector.shape_cast %48 : vector<1x8x128xf32> to vector<8x128xf32>
    %c5_24 = arith.constant 5 : index
    %50 = arith.index_cast %7 : i32 to index
    %c0_25 = arith.constant 0 : index
    %51 = vector.load %arg3[%c5_24, %50, %c0_25] : memref<9x8x128xf32, #tpu.memory_space<vmem>>, vector<1x8x128xf32>
    %52 = vector.shape_cast %51 : vector<1x8x128xf32> to vector<8x128xf32>
    %c6_26 = arith.constant 6 : index
    %53 = arith.index_cast %7 : i32 to index
    %c0_27 = arith.constant 0 : index
    %54 = vector.load %arg3[%c6_26, %53, %c0_27] : memref<9x8x128xf32, #tpu.memory_space<vmem>>, vector<1x8x128xf32>
    %55 = vector.shape_cast %54 : vector<1x8x128xf32> to vector<8x128xf32>
    %c7_28 = arith.constant 7 : index
    %56 = arith.index_cast %7 : i32 to index
    %c0_29 = arith.constant 0 : index
    %57 = vector.load %arg3[%c7_28, %56, %c0_29] : memref<9x8x128xf32, #tpu.memory_space<vmem>>, vector<1x8x128xf32>
    %58 = vector.shape_cast %57 : vector<1x8x128xf32> to vector<8x128xf32>
    %c8_30 = arith.constant 8 : index
    %59 = arith.index_cast %7 : i32 to index
    %c0_31 = arith.constant 0 : index
    %60 = vector.load %arg3[%c8_30, %59, %c0_31] : memref<9x8x128xf32, #tpu.memory_space<vmem>>, vector<1x8x128xf32>
    %61 = vector.shape_cast %60 : vector<1x8x128xf32> to vector<8x128xf32>
    %62 = arith.mulf %10, %37 : vector<8x128xf32>
    %63 = arith.mulf %19, %46 : vector<8x128xf32>
    %64 = arith.addf %62, %63 : vector<8x128xf32>
    %65 = arith.mulf %28, %55 : vector<8x128xf32>
    %66 = arith.addf %64, %65 : vector<8x128xf32>
    %67 = arith.mulf %13, %40 : vector<8x128xf32>
    %68 = arith.mulf %22, %49 : vector<8x128xf32>
    %69 = arith.addf %67, %68 : vector<8x128xf32>
    %70 = arith.mulf %31, %58 : vector<8x128xf32>
    %71 = arith.addf %69, %70 : vector<8x128xf32>
    %72 = arith.addf %66, %71 : vector<8x128xf32>
    %73 = arith.mulf %16, %43 : vector<8x128xf32>
    %74 = arith.mulf %25, %52 : vector<8x128xf32>
    %75 = arith.addf %73, %74 : vector<8x128xf32>
    %76 = arith.mulf %34, %61 : vector<8x128xf32>
    %77 = arith.addf %75, %76 : vector<8x128xf32>
    %78 = arith.addf %72, %77 : vector<8x128xf32>
    %cst_32 = arith.constant 1.000000e+00 : f32
    %79 = vector.broadcast %cst_32 : f32 to vector<8x128xf32>
    %80 = arith.subf %78, %79 : vector<8x128xf32>
    %cst_33 = arith.constant 5.000000e-01 : f32
    %81 = vector.broadcast %cst_33 : f32 to vector<8x128xf32>
    %82 = arith.mulf %80, %81 : vector<8x128xf32>
    %cst_34 = arith.constant -0.999998986 : f32
    %cst_35 = arith.constant 0.999998986 : f32
    %83 = vector.broadcast %cst_34 : f32 to vector<8x128xf32>
    %84 = arith.maximumf %83, %82 : vector<8x128xf32>
    %85 = vector.broadcast %cst_35 : f32 to vector<8x128xf32>
    %86 = arith.minimumf %85, %84 : vector<8x128xf32>
    %87 = math.absf %86 : vector<8x128xf32>
    %cst_36 = arith.constant 5.000000e-01 : f32
    %88 = vector.broadcast %cst_36 : f32 to vector<8x128xf32>
    %89 = arith.cmpf ole, %87, %88 : vector<8x128xf32>
    %90 = arith.mulf %87, %87 : vector<8x128xf32>
    %cst_37 = arith.constant 1.000000e+00 : f32
    %91 = vector.broadcast %cst_37 : f32 to vector<8x128xf32>
    %92 = arith.subf %91, %87 : vector<8x128xf32>
    %cst_38 = arith.constant 5.000000e-01 : f32
    %93 = vector.broadcast %cst_38 : f32 to vector<8x128xf32>
    %94 = arith.mulf %93, %92 : vector<8x128xf32>
    %95 = arith.select %89, %90, %94 : vector<8x128xi1>, vector<8x128xf32>
    %96 = math.sqrt %95 : vector<8x128xf32>
    %97 = arith.select %89, %87, %96 : vector<8x128xi1>, vector<8x128xf32>
    %cst_39 = arith.constant 4.216320e-02 : f32
    %98 = vector.broadcast %cst_39 : f32 to vector<8x128xf32>
    %99 = arith.mulf %98, %95 : vector<8x128xf32>
    %cst_40 = arith.constant 0.024181312 : f32
    %100 = vector.broadcast %cst_40 : f32 to vector<8x128xf32>
    %101 = arith.addf %99, %100 : vector<8x128xf32>
    %102 = arith.mulf %101, %95 : vector<8x128xf32>
    %cst_41 = arith.constant 0.0454700254 : f32
    %103 = vector.broadcast %cst_41 : f32 to vector<8x128xf32>
    %104 = arith.addf %102, %103 : vector<8x128xf32>
    %105 = arith.mulf %104, %95 : vector<8x128xf32>
    %cst_42 = arith.constant 0.0749530047 : f32
    %106 = vector.broadcast %cst_42 : f32 to vector<8x128xf32>
    %107 = arith.addf %105, %106 : vector<8x128xf32>
    %108 = arith.mulf %107, %95 : vector<8x128xf32>
    %cst_43 = arith.constant 0.166667521 : f32
    %109 = vector.broadcast %cst_43 : f32 to vector<8x128xf32>
    %110 = arith.addf %108, %109 : vector<8x128xf32>
    %111 = arith.mulf %97, %95 : vector<8x128xf32>
    %112 = arith.mulf %111, %110 : vector<8x128xf32>
    %113 = arith.addf %97, %112 : vector<8x128xf32>
    %cst_44 = arith.constant 1.57079637 : f32
    %114 = vector.broadcast %cst_44 : f32 to vector<8x128xf32>
    %115 = arith.subf %114, %113 : vector<8x128xf32>
    %cst_45 = arith.constant 2.000000e+00 : f32
    %116 = vector.broadcast %cst_45 : f32 to vector<8x128xf32>
    %117 = arith.mulf %116, %113 : vector<8x128xf32>
    %118 = arith.select %89, %115, %117 : vector<8x128xi1>, vector<8x128xf32>
    %cst_46 = arith.constant 0.000000e+00 : f32
    %119 = vector.broadcast %cst_46 : f32 to vector<8x128xf32>
    %120 = arith.cmpf olt, %86, %119 : vector<8x128xf32>
    %cst_47 = arith.constant 3.14159274 : f32
    %121 = vector.broadcast %cst_47 : f32 to vector<8x128xf32>
    %122 = arith.subf %121, %118 : vector<8x128xf32>
    %123 = arith.select %120, %122, %118 : vector<8x128xi1>, vector<8x128xf32>
    %124 = arith.mulf %86, %86 : vector<8x128xf32>
    %cst_48 = arith.constant 1.000000e+00 : f32
    %125 = vector.broadcast %cst_48 : f32 to vector<8x128xf32>
    %126 = arith.subf %125, %124 : vector<8x128xf32>
    %cst_49 = arith.constant 0.000000e+00 : f32
    %127 = vector.broadcast %cst_49 : f32 to vector<8x128xf32>
    %128 = arith.maximumf %126, %127 : vector<8x128xf32>
    %129 = math.sqrt %128 : vector<8x128xf32>
    %cst_50 = arith.constant 2.000000e+00 : f32
    %130 = vector.broadcast %cst_50 : f32 to vector<8x128xf32>
    %131 = arith.mulf %130, %129 : vector<8x128xf32>
    %cst_51 = arith.constant 9.99999997E-7 : f32
    %132 = vector.broadcast %cst_51 : f32 to vector<8x128xf32>
    %133 = arith.addf %131, %132 : vector<8x128xf32>
    %134 = arith.divf %123, %133 : vector<8x128xf32>
    %135 = arith.mulf %16, %40 : vector<8x128xf32>
    %136 = arith.mulf %25, %49 : vector<8x128xf32>
    %137 = arith.addf %135, %136 : vector<8x128xf32>
    %138 = arith.mulf %34, %58 : vector<8x128xf32>
    %139 = arith.addf %137, %138 : vector<8x128xf32>
    %140 = arith.mulf %13, %43 : vector<8x128xf32>
    %141 = arith.mulf %22, %52 : vector<8x128xf32>
    %142 = arith.addf %140, %141 : vector<8x128xf32>
    %143 = arith.mulf %31, %61 : vector<8x128xf32>
    %144 = arith.addf %142, %143 : vector<8x128xf32>
    %145 = arith.subf %139, %144 : vector<8x128xf32>
    %146 = arith.mulf %10, %43 : vector<8x128xf32>
    %147 = arith.mulf %19, %52 : vector<8x128xf32>
    %148 = arith.addf %146, %147 : vector<8x128xf32>
    %149 = arith.mulf %28, %61 : vector<8x128xf32>
    %150 = arith.addf %148, %149 : vector<8x128xf32>
    %151 = arith.mulf %16, %37 : vector<8x128xf32>
    %152 = arith.mulf %25, %46 : vector<8x128xf32>
    %153 = arith.addf %151, %152 : vector<8x128xf32>
    %154 = arith.mulf %34, %55 : vector<8x128xf32>
    %155 = arith.addf %153, %154 : vector<8x128xf32>
    %156 = arith.subf %150, %155 : vector<8x128xf32>
    %157 = arith.mulf %13, %37 : vector<8x128xf32>
    %158 = arith.mulf %22, %46 : vector<8x128xf32>
    %159 = arith.addf %157, %158 : vector<8x128xf32>
    %160 = arith.mulf %31, %55 : vector<8x128xf32>
    %161 = arith.addf %159, %160 : vector<8x128xf32>
    %162 = arith.mulf %10, %40 : vector<8x128xf32>
    %163 = arith.mulf %19, %49 : vector<8x128xf32>
    %164 = arith.addf %162, %163 : vector<8x128xf32>
    %165 = arith.mulf %28, %58 : vector<8x128xf32>
    %166 = arith.addf %164, %165 : vector<8x128xf32>
    %167 = arith.subf %161, %166 : vector<8x128xf32>
    %168 = arith.mulf %134, %145 : vector<8x128xf32>
    %169 = arith.mulf %134, %156 : vector<8x128xf32>
    %170 = arith.mulf %134, %167 : vector<8x128xf32>
    %171 = arith.mulf %168, %168 : vector<8x128xf32>
    %172 = arith.mulf %169, %169 : vector<8x128xf32>
    %173 = arith.addf %171, %172 : vector<8x128xf32>
    %174 = arith.mulf %170, %170 : vector<8x128xf32>
    %175 = arith.addf %173, %174 : vector<8x128xf32>
    %176 = math.sqrt %175 : vector<8x128xf32>
    %177 = arith.addf %5, %176 : vector<8x128xf32>
    %c1_i32 = arith.constant 1 : i32
    %178 = arith.addf %4, %177 : vector<8x128xf32>
    %c0_52 = arith.constant 0 : index
    %c0_53 = arith.constant 0 : index
    %c0_54 = arith.constant 0 : index
    %179 = vector.load %arg4[%c0_52, %c0_53, %c0_54] : memref<1x8x128xf32, #tpu.memory_space<vmem>>, vector<1x8x128xf32>
    %180 = vector.shape_cast %179 : vector<1x8x128xf32> to vector<8x128xf32>
    %181 = vector.shape_cast %178 : vector<8x128xf32> to vector<1x8x128xf32>
    tpu.vector_store %arg4[%c0_52, %c0_53, %c0_54], %181 {strides = array<i32>} : memref<1x8x128xf32, #tpu.memory_space<vmem>>, vector<1x8x128xf32>,
    return
  }
  func.func @transform_0(%arg0: i32, %arg1: i32) -> (i32, i32, i32) {
    %c1_i32 = arith.constant 1 : i32
    %0 = arith.muli %arg0, %c1_i32 : i32
    %1 = arith.addi %0, %arg1 : i32
    %c0_i32 = arith.constant 0 : i32
    %c0_i32_0 = arith.constant 0 : i32
    %c0_i32_1 = arith.constant 0 : i32
    return %c0_i32, %1, %c0_i32_0 : i32, i32, i32
  }
  func.func @transform_1(%arg0: i32, %arg1: i32) -> (i32, i32, i32) {
    %c1_i32 = arith.constant 1 : i32
    %0 = arith.muli %arg0, %c1_i32 : i32
    %1 = arith.addi %0, %arg1 : i32
    %c0_i32 = arith.constant 0 : i32
    %c0_i32_0 = arith.constant 0 : i32
    %c0_i32_1 = arith.constant 0 : i32
    return %c0_i32, %1, %c0_i32_0 : i32, i32, i32
  }
  func.func @transform_2(%arg0: i32, %arg1: i32) -> (i32, i32, i32) {
    %c0_i32 = arith.constant 0 : i32
    %c0_i32_0 = arith.constant 0 : i32
    %c0_i32_1 = arith.constant 0 : i32
    return %arg0, %c0_i32, %c0_i32_0 : i32, i32, i32
  }
}

</mosaic_0001>

<bundles_post_ra>
// kernel: tpu_custom_call.1
= control target key start
LH: loop header
LB: loop body
LE: loop exit
PB: predicated region body
PF: predicated region fallthrough
CT: control target
= control target key end

     0   :  { %7 = vsyncpa [#allocation3], 0  ;;  %s465_s0 = inlined_call_operand.hbm [shape: f32[9,8,128], index: 0, kind: input, shape index: {}]   ;;  %s466_s1 = inlined_call_operand.hbm [shape: f32[9,8,128], index: 1, kind: input, shape index: {}]   ;;  %s467_s2 = inlined_call_operand.hbm [shape: f32[1,8,128], index: 2, kind: output, shape index: {}]  }
   0x1   :  { %8 = vsyncpa [#allocation6], 0 }
   0x2   :  { %9 = vsyncpa [#allocation4], 0  ;;  %s327_s9 = smov [#allocation2]  }
   0x3   :  { %s18_s10 = sshll.u32 %s327_s9, 4  ;;  %s19_s10 = int_to_ptr.vmem [resolvable:$true] %s18_s10 }
   0x4   :  { %s269_s11 = scalar_lea.vmem %s19_s10, 1152  ;;  %p274_p1 = scmp.lt.s32.totalorder %s19_s10, %s19_s10 }
   0x5   :  { %p270_p0 = scmp.ne.s32.totalorder %s19_s10, %s269_s11  ;;  %p275_p2 = scmp.lt.s32.totalorder %s269_s11, %s269_s11 }
   0x7   :  { %p276_p3 = por %p275_p2, %p274_p1 }
   0x9   :  { %p277_p4 = pnand %p276_p3, %p270_p0 }
   0xb   :  { %280 = shalt.err (!%p277_p4)
}
   0xc   :  { %s328_s12 = smov 128   ;;  %s329_s13 = smov 8  }
   0xd   :  { %24 = dma.hbm_to_vmem [thread:$0]  %s465_s0, 1152, %s19_s10, [#allocation3], %s328_s12, %s328_s12, %s329_s13  }
   0xe   :  { %s330_s16 = smov [#allocation5]  }
   0xf   :  { %s33_s17 = sshll.u32 %s330_s16, 4  ;;  %s34_s17 = int_to_ptr.vmem [resolvable:$true] %s33_s17 }
  0x10   :  { %s289_s18 = scalar_lea.vmem %s34_s17, 1152  ;;  %p294_p6 = scmp.lt.s32.totalorder %s34_s17, %s34_s17 }
  0x11   :  { %p290_p5 = scmp.ne.s32.totalorder %s34_s17, %s289_s18  ;;  %p295_p7 = scmp.lt.s32.totalorder %s289_s18, %s289_s18 }
  0x13   :  { %p296_p8 = por %p295_p7, %p294_p6 }
  0x15   :  { %p297_p9 = pnand %p296_p8, %p290_p5 }
  0x17   :  { %300 = shalt.err (!%p297_p9)
}
  0x18   :  { %39 = dma.hbm_to_vmem [thread:$0]  %s466_s1, 1152, %s34_s17, [#allocation6], %s328_s12, %s328_s12, %s329_s13  }
  0x19   :  { %321 = dma.done.wait [#allocation3], 1152  }
  0x1a   :  { %322 = vsyncadd [#allocation3], 4294966144 }
  0x1b   :  { %323 = dma.done.wait [#allocation6], 1152  }
  0x1c   :  { %324 = vsyncadd [#allocation6], 4294966144  ;;  %v353_v0 = vld [vmem:[#allocation2] sm:$0xff]  ;;  %v355_v1 = vld [vmem:[#allocation2 + $0x8] sm:$0xff]  ;;  %s331_s0 = smov [#allocation7]  }
  0x1d   :  { %v357_v2 = vld [vmem:[#allocation2 + $0x10] sm:$0xff]  ;;  %v359_v3 = vld [vmem:[#allocation2 + $0x18] sm:$0xff]  ;;  %v361_v4 = vld [vmem:[#allocation2 + $0x20] sm:$0xff]  ;;  %s219_s1 = sshll.u32 %s331_s0, 4  ;;  %s220_s1 = int_to_ptr.vmem [resolvable:$true] %s219_s1 }
  0x1e   :  { %v363_v5 = vld [vmem:[#allocation2 + $0x28] sm:$0xff]  ;;  %v365_v6 = vld [vmem:[#allocation2 + $0x30] sm:$0xff]  ;;  %v367_v7 = vld [vmem:[#allocation2 + $0x38] sm:$0xff]  ;;  %s301_s21 = scalar_lea.vmem %s220_s1, 128  ;;  %p306_p11 = scmp.lt.s32.totalorder %s220_s1, %s220_s1 }
  0x1f   :  { %v369_v8 = vld [vmem:[#allocation2 + $0x40] sm:$0xff]  ;;  %v371_v9 = vld [vmem:[#allocation5] sm:$0xff]  ;;  %v373_v10 = vld [vmem:[#allocation5 + $0x8] sm:$0xff]  ;;  %p302_p10 = scmp.ne.s32.totalorder %s220_s1, %s301_s21  ;;  %p307_p12 = scmp.lt.s32.totalorder %s301_s21, %s301_s21 }
  0x20   :  { %v375_v11 = vld [vmem:[#allocation5 + $0x10] sm:$0xff]  ;;  %v377_v12 = vld [vmem:[#allocation5 + $0x18] sm:$0xff]  ;;  %v379_v13 = vld [vmem:[#allocation5 + $0x20] sm:$0xff]  ;;  %v96_v15 = vmul.f32 %v371_v9, %v353_v0  ;;  %v101_v16 = vmul.f32 %v373_v10, %v355_v1 }
  0x21   :  { %v381_v14 = vld [vmem:[#allocation5 + $0x28] sm:$0xff]  ;;  %v107_v17 = vmul.f32 %v375_v11, %v357_v2  ;;  %v389_v18 = vld [vmem:[#allocation5 + $0x30] sm:$0xff]  ;;  %v391_v19 = vld [vmem:[#allocation5 + $0x38] sm:$0xff]  ;;  %v97_v21 = vmul.f32 %v377_v12, %v359_v3  ;;  %v102_v22 = vmul.f32 %v379_v13, %v361_v4  ;;  %p308_p13 = por %p307_p12, %p306_p11 }
  0x22   :  { %v393_v20 = vld [vmem:[#allocation5 + $0x40] sm:$0xff]  ;;  %v108_v23 = vmul.f32 %v381_v14, %v363_v5  ;;  %v99_v24 = vmul.f32 %v389_v18, %v365_v6  ;;  %v104_v25 = vmul.f32 %v391_v19, %v367_v7 }
  0x23   :  { %v110_v26 = vmul.f32 %v393_v20, %v369_v8  ;;  %v98_v27 = vadd.f32 %v97_v21, %v96_v15  ;;  %v103_v28 = vadd.f32 %v102_v22, %v101_v16  ;;  %v162_v16 = vmul.f32 %v373_v10, %v357_v2  ;;  %p309_p0 = pnand %p308_p13, %p302_p10 }
  0x24   :  { %v109_v29 = vadd.f32 %v108_v23, %v107_v17  ;;  %v163_v21 = vmul.f32 %v379_v13, %v363_v5  ;;  %v167_v22 = vmul.f32 %v375_v11, %v355_v1  ;;  %v168_v23 = vmul.f32 %v381_v14, %v361_v4 }
  0x25   :  { %v100_v30 = vadd.f32 %v99_v24, %v98_v27  ;;  %v105_v31 = vadd.f32 %v104_v25, %v103_v28  ;;  %v174_v27 = vmul.f32 %v381_v14, %v359_v3  ;;  %v178_v28 = vmul.f32 %v371_v9, %v357_v2 }
  0x26   :  { %v111_v32 = vadd.f32 %v110_v26, %v109_v29  ;;  %v173_v26 = vmul.f32 %v375_v11, %v353_v0  ;;  %v179_v29 = vmul.f32 %v377_v12, %v363_v5  ;;  %v189_v11 = vmul.f32 %v373_v10, %v353_v0 }
  0x27   :  { %v106_v33 = vadd.f32 %v105_v31, %v100_v30  ;;  %v184_v30 = vmul.f32 %v371_v9, %v355_v1  ;;  %v185_v31 = vmul.f32 %v377_v12, %v361_v4  ;;  %v190_v14 = vmul.f32 %v379_v13, %v359_v3 }
  0x28   :  { %v165_v2 = vmul.f32 %v391_v19, %v369_v8  ;;  %v170_v5 = vmul.f32 %v393_v20, %v367_v7  ;;  %v169_v1 = vadd.f32 %v168_v23, %v167_v22  ;;  %v176_v4 = vmul.f32 %v393_v20, %v365_v6 }
  0x29   :  { %v112_v34 = vadd.f32 %v111_v32, %v106_v33  ;;  %v164_v33 = vadd.f32 %v163_v21, %v162_v16  ;;  %v181_v9 = vmul.f32 %v389_v18, %v369_v8  ;;  %v175_v12 = vadd.f32 %v174_v27, %v173_v26 }
  0x2a   :  { %v180_v0 = vadd.f32 %v179_v29, %v178_v28  ;;  %v186_v10 = vadd.f32 %v185_v31, %v184_v30  ;;  %v187_v3 = vmul.f32 %v389_v18, %v367_v7 }
  0x2b   :  { %v245_v35 = vadd.f32 -1.0, %v112_v34  ;;  %v166_v20 = vadd.f32 %v165_v2, %v164_v33 }
  0x2c   :  { %v182_v8 = vadd.f32 %v181_v9, %v180_v0 }
  0x2d   :  { %v114_v36 = vmul.f32 0.5, %v245_v35 }
  0x2f   :  { %v407_v37 = vclamps-f32 %v114_v36, 0.999999  ;;  %v191_v36 = vadd.f32 %v190_v14, %v189_v11 }
  0x31   :  { %v410_v38 = vand.u32 2147483647, %v407_v37  ;;  %v148_v39 = vmul.f32 %v407_v37, %v407_v37  ;;  %vm145_vm5 = vcmp.lt.f32.partialorder %v407_v37, 0.0 }
  0x33   :  { %v119_v40 = vmul.f32 %v410_v38, %v410_v38  ;;  %v120_v41 = vsub.f32 1.0, %v410_v38  ;;  %v149_v42 = vsub.f32 1.0, %v148_v39  ;;  %vm118_vm0 = vcmp.le.f32.partialorder %v410_v38, 0.5 }
  0x34   :  { %v192_v39 = vmul.f32 %v391_v19, %v365_v6 }
  0x35   :  { %v121_v43 = vmul.f32 0.5, %v120_v41  ;;  %v150_v44 = vmax.f32 %v149_v42, 0.0  ;;  %v171_v42 = vadd.f32 %v170_v5, %v169_v1 }
  0x37   :  { %v122_v45 = vsel %vm118_vm0, %v119_v40, %v121_v43  ;;  %253 = vrsqrt.f32 %v150_v44  ;;  %vm153_vm1 = vcmp.eq.f32.partialorder %v150_v44, inf  ;;  %vm155_vm2 = vcmp.eq.f32.partialorder %v150_v44, 0.0 }
  0x38   :  { %255 = vrsqrt.f32 %v122_v45  ;;  %v131_v46 = vmul.f32 0.0421632, %v122_v45  ;;  %v156_v53 = vand.u32 2147483648, %v150_v44  ;;  %vm125_vm3 = vcmp.eq.f32.partialorder %v122_v45, inf }
  0x39   :  { %v128_v55 = vand.u32 2147483648, %v122_v45  ;;  %vm127_vm4 = vcmp.eq.f32.partialorder %v122_v45, 0.0  ;;  %v177_v43 = vadd.f32 %v176_v4, %v175_v12  ;;  %v172_v7 = vsub.f32 %v166_v20, %v171_v42 }
  0x3a   :  { %v132_v47 = vadd.f32 0.024181312, %v131_v46 }
  0x3b   :  { %v183_v18 = vsub.f32 %v177_v43, %v182_v8 }
  0x3c   :  { %v133_v48 = vmul.f32 %v132_v47, %v122_v45 }
  0x3e   :  { %v134_v49 = vadd.f32 0.045470025, %v133_v48 }
  0x40   :  { %v135_v50 = vmul.f32 %v134_v49, %v122_v45 }
  0x42   :  { %v136_v51 = vadd.f32 0.074953005, %v135_v50 }
  0x44   :  { %v254_v52 = vpop.eup %253  ;;  %v137_v56 = vmul.f32 %v136_v51, %v122_v45 }
  0x45   :  { %v256_v54 = vpop.eup %255  ;;  %v152_v57 = vmul.f32 %v254_v52, %v150_v44 }
  0x46   :  { %v124_v58 = vmul.f32 %v256_v54, %v122_v45  ;;  %v138_v63 = vadd.f32 0.16666752, %v137_v56 }
  0x47   :  { %v154_v59 = vsel %vm153_vm1, %v150_v44, %v152_v57  ;;  %v188_v44 = vadd.f32 %v187_v3, %v186_v10 }
  0x48   :  { %v126_v60 = vsel %vm125_vm3, %v122_v45, %v124_v58  ;;  %v157_v61 = vsel %vm155_vm2, %v156_v53, %v154_v59 }
  0x49   :  { %v129_v62 = vsel %vm127_vm4, %v128_v55, %v126_v60  ;;  %v158_v15 = vmul.f32 2.0, %v157_v61 }
  0x4a   :  { %v130_v17 = vsel %vm118_vm0, %v410_v38, %v129_v62 }
  0x4b   :  { %v139_v24 = vmul.f32 %v130_v17, %v122_v45  ;;  %v159_v25 = vadd.f32 1e-06, %v158_v15  ;;  %v193_v45 = vadd.f32 %v192_v39, %v191_v36 }
  0x4d   :  { %v140_v32 = vmul.f32 %v139_v24, %v138_v63  ;;  %257 = vrcp.f32 %v159_v25  ;;  %v194_v47 = vsub.f32 %v188_v44, %v193_v45 }
  0x4f   :  { %v141_v34 = vadd.f32 %v140_v32, %v130_v17 }
  0x51   :  { %v142_v13 = vsub.f32 1.5707964, %v141_v34  ;;  %v143_v35 = vmul.f32 2.0, %v141_v34 }
  0x53   :  { %v144_v40 = vsel %vm118_vm0, %v142_v13, %v143_v35 }
  0x54   :  { %v146_v41 = vsub.f32 3.1415927, %v144_v40 }
  0x56   :  { %v147_v46 = vsel %vm145_vm5, %v146_v41, %v144_v40 }
  0x5a   :  { %v258_v48 = vpop.eup %257 }
  0x5b   :  { %v161_v49 = vmul.f32 %v258_v48, %v147_v46 }
  0x5d   :  { %v195_v50 = vmul.f32 %v172_v7, %v161_v49  ;;  %v196_v6 = vmul.f32 %v183_v18, %v161_v49  ;;  %v197_v19 = vmul.f32 %v194_v47, %v161_v49 }
  0x5f   :  { %v198_v38 = vmul.f32 %v195_v50, %v195_v50  ;;  %v199_v51 = vmul.f32 %v196_v6, %v196_v6  ;;  %v201_v52 = vmul.f32 %v197_v19, %v197_v19 }
  0x61   :  { %v200_v53 = vadd.f32 %v199_v51, %v198_v38 }
  0x63   :  { %v202_v54 = vadd.f32 %v201_v52, %v200_v53 }
  0x65   :  { %259 = vrsqrt.f32 %v202_v54  ;;  %vm205_vm6 = vcmp.eq.f32.partialorder %v202_v54, inf  ;;  %v208_v37 = vand.u32 2147483648, %v202_v54  ;;  %vm207_vm7 = vcmp.eq.f32.partialorder %v202_v54, 0.0 }
  0x72   :  { %v260_v55 = vpop.eup %259 }
  0x73   :  { %v204_v56 = vmul.f32 %v260_v55, %v202_v54 }
  0x75   :  { %v206_v57 = vsel %vm205_vm6, %v202_v54, %v204_v56 }
  0x76   :  { %v209_v58 = vsel %vm207_vm7, %v208_v37, %v206_v57 }
  0x77   :  { %212 = vst [vmem:[#allocation7] sm:$0xff] %v209_v58 }
  0x78   :  { %312 = shalt.err (!%p309_p0)
}
  0x79   :  { %222 = dma.vmem_to_hbm [thread:$0]  %s220_s1, 128, %s467_s2, [#allocation4]  }
  0x7a   :  { %325 = dma.done.wait [#allocation4], 128  }
  0x7b   :  { %326 = vsyncadd [#allocation4], 4294967168 }
  0x7c   :  { %226 = vsyncpa [#allocation3], 1 }
  0x7d   :  { %227 = vsyncpa [#allocation6], 1 }
  0x7e   :  { %228 = vsyncpa [#allocation4], 1 }

</bundles_post_ra>
